<compile_context>
chip_gen: v7x
topology: tpu7x:2x2x1
jax: 0.10.0
libtpu: 0.0.40
codegen_flags: <defaults>
</compile_context>

<pallas_src>
import functools

import jax
import jax.numpy as jnp
from jax.experimental import pallas as pl
from jax.experimental.pallas import tpu as pltpu


def _round_up(n, m):
    return ((n + m - 1) // m) * m


def _round_down(n, m):
    return (n // m) * m


# ----------------------------------------------------------------------------
# Kernel
# ----------------------------------------------------------------------------
def _inv_layer_kernel(
    x_ref,
    w1a_ref, b1a_ref, w1b_ref, b1b_ref,          # weight_1: size_2 -> hidden -> size_1
    w23a_ref, b23a_ref,                          # fused first layers of weight_2|weight_3
    w2b_ref, b2b_ref,                            # weight_2 second layer: hidden -> size_2
    w3b_ref, b3b_ref,                            # weight_3 second layer: hidden -> size_2
    out_ref,
    *jac_refs,
    clamp: float, rev: bool, s1p: int, hp: int, tile_b: int,
    batch_true: int, mask_rows: bool, cal_jacobian: bool,
):
    f32 = jnp.float32
    jac_ref = jac_refs[0] if cal_jacobian else None

    x = x_ref[...]
    x1 = x[:, :s1p].astype(f32)
    x2 = x[:, s1p:].astype(f32)

    # Biases are stored f32, hoisted once per invocation.
    b1a = b1a_ref[...]
    b1b = b1b_ref[...]
    b23a = b23a_ref[...]
    b2b = b2b_ref[...]
    b3b = b3b_ref[...]

    def dot(a, w_ref):
        w = w_ref[...]
        # bf16 weights -> bf16 MXU operands, f32 accumulation.
        return jnp.dot(a.astype(w.dtype), w, preferred_element_type=f32)

    def leaky(h):
        return jnp.where(h >= 0, h, 0.2 * h)

    def mlp_w1(v):
        h = leaky(dot(v, w1a_ref) + b1a)
        return dot(h, w1b_ref) + b1b

    def mlp_w2_w3(v):
        # Fused first layer of weight_2 and weight_3 (shared input v).
        h = leaky(dot(v, w23a_ref) + b23a)
        return dot(h[:, :hp], w2b_ref) + b2b, dot(h[:, hp:], w3b_ref) + b3b

    clamp_f = f32(clamp)
    if rev:
        # y1 = x1 + W1(x2); s = clamp*(2*sigmoid(W2(y1)) - 1); y2 = x2*exp(s) + W3(y1)
        y1 = x1 + mlp_w1(x2)
        u2, u3 = mlp_w2_w3(y1)
        s = clamp_f * (jax.nn.sigmoid(u2) * 2.0 - 1.0)
        y2 = x2 * jnp.exp(s) + u3
        sign = -1.0
    else:
        # s = clamp*(2*sigmoid(W2(x1)) - 1); y2 = (x2 - W3(x1))/exp(s); y1 = x1 - W1(y2)
        u2, u3 = mlp_w2_w3(x1)
        s = clamp_f * (jax.nn.sigmoid(u2) * 2.0 - 1.0)
        y2 = (x2 - u3) * jnp.exp(-s)
        y1 = x1 - mlp_w1(y2)
        sign = 1.0

    # Padded feature columns are exactly zero by construction of the zero-padded
    # weights; padded batch rows (biases make them nonzero) are masked here.
    if mask_rows or cal_jacobian:
        rows = pl.program_id(0) * tile_b + jax.lax.broadcasted_iota(
            jnp.int32, (tile_b, 1), 0)
        valid = (rows < batch_true).astype(f32)
    if mask_rows:
        y1 = y1 * valid
        y2 = y2 * valid

    # Lane-dense combined output slab: [y1 | y2] (both halves 128-aligned).
    out_ref[:, :s1p] = y1.astype(out_ref.dtype)
    out_ref[:, s1p:] = y2.astype(out_ref.dtype)

    if cal_jacobian:
        sj = s * valid if mask_rows else s
        tile_jac = f32(sign) * jnp.sum(sj)
        # One aligned (8,128) scalar slot per grid step (parallel-safe).
        jac_ref[...] = jnp.full((1, 8, 128), tile_jac, dtype=jnp.float32)


# ----------------------------------------------------------------------------
# Parameter init / packing
# ----------------------------------------------------------------------------
def init_inv_layer_params(key, size_1, size_2, hidden=100, dtype=jnp.float32):
    """Raw (PyTorch-layout) params: weights as (in, out), biases as (1, out)."""
    def linear(k, fan_in, fan_out):
        kw, kb = jax.random.split(k)
        bound = 1.0 / jnp.sqrt(jnp.float32(fan_in))
        w = jax.random.uniform(kw, (fan_in, fan_out), dtype, -bound, bound)
        b = jax.random.uniform(kb, (1, fan_out), dtype, -bound, bound)
        return w, b

    keys = jax.random.split(key, 6)
    w1a, b1a = linear(keys[0], size_2, hidden)   # weight_1 layer 0
    w1b, b1b = linear(keys[1], hidden, size_1)   # weight_1 layer 2
    w2a, b2a = linear(keys[2], size_1, hidden)   # weight_2 layer 0
    w2b, b2b = linear(keys[3], hidden, size_2)   # weight_2 layer 2
    w3a, b3a = linear(keys[4], size_1, hidden)   # weight_3 layer 0
    w3b, b3b = linear(keys[5], hidden, size_2)   # weight_3 layer 2
    return (w1a, b1a, w1b, b1b, w2a, b2a, w2b, b2b, w3a, b3a, w3b, b3b)


def pack_inv_layer_params(raw_params, *, size_1, size_2, hidden,
                          param_dtype=jnp.bfloat16):
    """Zero-pad to 128-aligned shapes, fuse weight_2/weight_3 first layers.

    bf16 weights are the default (native MXU path on v5e/v6e/v7x, half the
    weight DMA); biases stay f32 (added after f32 accumulation).
    """
    (w1a, b1a, w1b, b1b, w2a, b2a, w2b, b2b, w3a, b3a, w3b, b3b) = raw_params
    s1p = _round_up(size_1, 128)
    s2p = _round_up(size_2, 128)
    hp = _round_up(hidden, 128)

    def pad_w(w, rows, cols):
        out = jnp.zeros((rows, cols), jnp.float32)
        return out.at[:w.shape[0], :w.shape[1]].set(w.astype(jnp.float32))

    def pad_b(b, cols):
        out = jnp.zeros((1, cols), jnp.float32)
        return out.at[:, :b.shape[1]].set(b.astype(jnp.float32))

    w1a_p = pad_w(w1a, s2p, hp).astype(param_dtype)
    b1a_p = pad_b(b1a, hp)
    w1b_p = pad_w(w1b, hp, s1p).astype(param_dtype)
    b1b_p = pad_b(b1b, s1p)
    w23a_p = jnp.concatenate(
        [pad_w(w2a, s1p, hp), pad_w(w3a, s1p, hp)], axis=1).astype(param_dtype)
    b23a_p = jnp.concatenate([pad_b(b2a, hp), pad_b(b3a, hp)], axis=1)
    w2b_p = pad_w(w2b, hp, s2p).astype(param_dtype)
    b2b_p = pad_b(b2b, s2p)
    w3b_p = pad_w(w3b, hp, s2p).astype(param_dtype)
    b3b_p = pad_b(b3b, s2p)

    packed = (w1a_p, b1a_p, w1b_p, b1b_p, w23a_p, b23a_p,
              w2b_p, b2b_p, w3b_p, b3b_p)
    dims = {"s1p": s1p, "s2p": s2p, "hp": hp}
    return packed, dims


# ----------------------------------------------------------------------------
# Padded-slab helpers (pad once at the network boundary, not per layer call)
# ----------------------------------------------------------------------------
def pad_activations(x, dims, *, size_1, size_2, act_dtype=None):
    s1p, s2p = dims["s1p"], dims["s2p"]
    cp = s1p + s2p
    B = x.shape[0]
    b_pad = _round_up(max(B, 1), 8)
    dtype = x.dtype if act_dtype is None else act_dtype
    x_pad = jnp.zeros((b_pad, cp), dtype)
    x_pad = x_pad.at[:B, :size_1].set(x[:, :size_1].astype(dtype))
    x_pad = x_pad.at[:B, s1p:s1p + size_2].set(
        x[:, size_1:size_1 + size_2].astype(dtype))
    return x_pad


def unpad_activations(y_pad, dims, *, size_1, size_2, batch):
    s1p = dims["s1p"]
    return jnp.concatenate(
        [y_pad[:batch, :size_1], y_pad[:batch, s1p:s1p + size_2]], axis=1)


# ----------------------------------------------------------------------------
# VMEM budgeting / tile selection
# ----------------------------------------------------------------------------
def _vmem_budget_bytes():
    try:
        cap = int(pltpu.get_tpu_info().vmem_capacity_bytes)
    except Exception:
        cap = 64 * 1024 * 1024          # conservative: v7x per-TC capacity
    return min(max(32 * 1024 * 1024, int(cap * 0.85)), 110 * 1024 * 1024)


def _resident_spec(shape):
    """Full-array, VMEM-resident operand; single-buffered (constant index_map)."""
    try:
        return pl.BlockSpec(shape, lambda i: (0, 0),
                            pipeline_mode=pl.Buffered(1))
    except TypeError:   # older jax without pipeline_mode: fall back to default
        return pl.BlockSpec(shape, lambda i: (0, 0))


def _fit_tile(b_pad, tile_cap):
    """Largest multiple of 8 <= tile_cap that divides b_pad (8 always divides)."""
    best, t = 8, 8
    while t <= tile_cap:
        if b_pad % t == 0:
            best = t
        t += 8
    return best


# ----------------------------------------------------------------------------
# Core forward on a padded [x1|x2] slab
# ----------------------------------------------------------------------------
def inv_layer_forward_padded(x_pad, packed_params, dims, *, batch, clamp=1.0,
                             rev=False, cal_jacobian=False, max_tile=None):
    s1p, s2p, hp = dims["s1p"], dims["s2p"], dims["hp"]
    cp = s1p + s2p
    assert x_pad.shape[1] == cp and x_pad.shape[0] % 8 == 0
    b_pad = x_pad.shape[0]
    act_dtype = x_pad.dtype
    act_bytes = jnp.dtype(act_dtype).itemsize

    weight_bytes = sum(int(p.size) * jnp.dtype(p.dtype).itemsize
                       for p in packed_params)
    vmem_budget = _vmem_budget_bytes()

    # VMEM model: x slab double-buffered + out slab double-buffered + f32 temps,
    # plus single-buffered resident weights and a small jac block.
    per_row = 2 * cp * act_bytes + 2 * cp * act_bytes + (2 * hp + 4 * cp) * 4
    fixed = weight_bytes + 2 * 8 * 128 * 4 + (2 << 20)
    tile_cap = max(8, (vmem_budget - fixed) // per_row)
    tile_cap = min(tile_cap, 2048, b_pad)
    if max_tile is not None:
        tile_cap = min(tile_cap, int(max_tile))
    if b_pad >= 16:
        # Ensure >=2 grid steps so both v7x TensorCores get work (1 TC chips
        # only pay one extra ~0.35us step).
        tile_cap = min(tile_cap, max(8, _round_down(b_pad // 2, 8)))
    tile_cap = max(8, _round_down(tile_cap, 8))

    tile_b = _fit_tile(b_pad, tile_cap)
    if tile_b < max(8, tile_cap // 2):
        tile_b = tile_cap                     # accept a small row re-pad instead
    b_grid = _round_up(b_pad, tile_b)
    if b_grid != b_pad:
        x_pad = jnp.pad(x_pad, ((0, b_grid - b_pad), (0, 0)))
    n_tiles = b_grid // tile_b
    mask_rows = b_grid > batch

    kernel = functools.partial(
        _inv_layer_kernel, clamp=float(clamp), rev=bool(rev), s1p=s1p, hp=hp,
        tile_b=tile_b, batch_true=int(batch), mask_rows=bool(mask_rows),
        cal_jacobian=bool(cal_jacobian))

    w_specs = [_resident_spec(p.shape) for p in packed_params]

    out_specs = [pl.BlockSpec((tile_b, cp), lambda i: (i, 0))]
    out_shapes = [jax.ShapeDtypeStruct((b_grid, cp), act_dtype)]
    if cal_jacobian:
        out_specs.append(pl.BlockSpec((1, 8, 128), lambda i: (i, 0, 0)))
        out_shapes.append(jax.ShapeDtypeStruct((n_tiles, 8, 128), jnp.float32))

    est_vmem = fixed + tile_b * per_row
    vmem_limit = int(min(max(32 << 20, int(est_vmem * 1.25) + (4 << 20)),
                         vmem_budget))

    flops_per_row = 6 * hp * (s1p + s2p)
    cost = pl.CostEstimate(
        flops=int(b_grid * flops_per_row),
        transcendentals=int(2 * b_grid * s2p),
        bytes_accessed=int(2 * b_grid * cp * act_bytes + weight_bytes),
    )

    results = pl.pallas_call(
        kernel,
        grid=(n_tiles,),
        in_specs=[pl.BlockSpec((tile_b, cp), lambda i: (i, 0))] + w_specs,
        out_specs=tuple(out_specs),
        out_shape=tuple(out_shapes),
        compiler_params=pltpu.CompilerParams(
            dimension_semantics=("parallel",),
            vmem_limit_bytes=vmem_limit),
        cost_estimate=cost,
    )(x_pad, *packed_params)

    if cal_jacobian:
        out_pad, jac_tiles = results
        jac = jnp.sum(jac_tiles[:, 0, 0]) / jnp.float32(batch)
        return out_pad[:b_pad], jac
    (out_pad,) = results
    return out_pad[:b_pad]


# ----------------------------------------------------------------------------
# Convenience wrapper on raw (B, size_1+size_2) input (pads/unpads per call)
# ----------------------------------------------------------------------------
def inv_layer_forward(x, packed_params, dims, *, size_1, size_2, clamp=1.0,
                      rev=False, cal_jacobian=False, max_tile=None,
                      act_dtype=None):
    B = x.shape[0]
    if act_dtype is None:
        act_dtype = packed_params[0].dtype     # carry activations in weight dtype
    x_pad = pad_activations(x, dims, size_1=size_1, size_2=size_2,
                            act_dtype=act_dtype)
    res = inv_layer_forward_padded(
        x_pad, packed_params, dims, batch=B, clamp=clamp, rev=rev,
        cal_jacobian=cal_jacobian, max_tile=max_tile)
    if cal_jacobian:
        y_pad, jac = res
        y = unpad_activations(y_pad, dims, size_1=size_1, size_2=size_2, batch=B)
        return y, jac
    return unpad_activations(res, dims, size_1=size_1, size_2=size_2, batch=B)


# ----------------------------------------------------------------------------
# Pure-JAX reference (mirrors the PyTorch forward)
# ----------------------------------------------------------------------------
def _reference_forward(x, raw_params, *, size_1, size_2, clamp=1.0, rev=False):
    (w1a, b1a, w1b, b1b, w2a, b2a, w2b, b2b, w3a, b3a, w3b, b3b) = raw_params
    x1, x2 = x[:, :size_1], x[:, size_1:size_1 + size_2]

    def mlp(v, wa, ba, wb, bb):
        h = v @ wa + ba
        h = jnp.where(h >= 0, h, 0.2 * h)
        return h @ wb + bb

    if rev:
        y1 = x1 + mlp(x2, w1a, b1a, w1b, b1b)
        s = clamp * (jax.nn.sigmoid(mlp(y1, w2a, b2a, w2b, b2b)) * 2 - 1)
        y2 = x2 * jnp.exp(s) + mlp(y1, w3a, b3a, w3b, b3b)
        jac = -jnp.sum(s)
    else:
        s = clamp * (jax.nn.sigmoid(mlp(x1, w2a, b2a, w2b, b2b)) * 2 - 1)
        y2 = (x2 - mlp(x1, w3a, b3a, w3b, b3b)) / jnp.exp(s)
        y1 = x1 - mlp(y2, w1a, b1a, w1b, b1b)
        jac = jnp.sum(s)
    return jnp.concatenate([y1, y2], axis=1), jac / x.shape[0]


if __name__ == "__main__":
    B, SIZE_1, SIZE_2, HIDDEN, CLAMP = 8, 16, 16, 32, 1.0

    key = jax.random.PRNGKey(0)
    key_x, key_x2, key_p = jax.random.split(key, 3)
    x = jax.random.normal(key_x, (B, SIZE_1 + SIZE_2), jnp.float32)
    raw = init_inv_layer_params(key_p, SIZE_1, SIZE_2, hidden=HIDDEN)

    # --- f32 path: tight correctness checks ---------------------------------
    packed_f32, dims = pack_inv_layer_params(
        raw, size_1=SIZE_1, size_2=SIZE_2, hidden=HIDDEN,
        param_dtype=jnp.float32)

    out_fwd, jac_fwd = inv_layer_forward(
        x, packed_f32, dims, size_1=SIZE_1, size_2=SIZE_2, clamp=CLAMP,
        rev=False, cal_jacobian=True)
    out_rev, jac_rev = inv_layer_forward(
        out_fwd, packed_f32, dims, size_1=SIZE_1, size_2=SIZE_2, clamp=CLAMP,
        rev=True, cal_jacobian=True)
    jax.block_until_ready((out_fwd, jac_fwd, out_rev, jac_rev))

    ref_fwd, ref_jac = _reference_forward(
        x, raw, size_1=SIZE_1, size_2=SIZE_2, clamp=CLAMP, rev=False)
    ref_rev, ref_jac_rev = _reference_forward(
        out_fwd, raw, size_1=SIZE_1, size_2=SIZE_2, clamp=CLAMP, rev=True)

    assert jnp.allclose(out_fwd, ref_fwd, atol=1e-4, rtol=1e-4)
    assert jnp.allclose(jac_fwd, ref_jac, atol=1e-4, rtol=1e-4)
    assert jnp.allclose(out_rev, x, atol=1e-3, rtol=1e-3)            # invertibility
    assert jnp.allclose(jac_rev, ref_jac_rev, atol=1e-4, rtol=1e-4)

    # --- cal_jacobian=False path (no jac output / work) ----------------------
    out_nojac = inv_layer_forward(
        x, packed_f32, dims, size_1=SIZE_1, size_2=SIZE_2, clamp=CLAMP,
        rev=False, cal_jacobian=False)
    jax.block_until_ready(out_nojac)
    assert jnp.allclose(out_nojac, ref_fwd, atol=1e-4, rtol=1e-4)

    # --- multi-tile grid + batch padding/masking -----------------------------
    B2 = 20
    x_b2 = jax.random.normal(key_x2, (B2, SIZE_1 + SIZE_2), jnp.float32)
    out2, jac2 = inv_layer_forward(
        x_b2, packed_f32, dims, size_1=SIZE_1, size_2=SIZE_2, clamp=CLAMP,
        rev=False, cal_jacobian=True, max_tile=8)   # forces a 3-step grid
    ref2, ref_jac2 = _reference_forward(
        x_b2, raw, size_1=SIZE_1, size_2=SIZE_2, clamp=CLAMP, rev=False)
    jax.block_until_ready((out2, jac2))
    assert jnp.allclose(out2, ref2, atol=1e-4, rtol=1e-4)
    assert jnp.allclose(jac2, ref_jac2, atol=1e-4, rtol=1e-4)

    # --- padded-slab composition (pad once at the network boundary) ----------
    xp = pad_activations(x, dims, size_1=SIZE_1, size_2=SIZE_2,
                         act_dtype=jnp.float32)
    yp = inv_layer_forward_padded(xp, packed_f32, dims, batch=B,
                                  clamp=CLAMP, rev=False)
    xr = inv_layer_forward_padded(yp, packed_f32, dims, batch=B,
                                  clamp=CLAMP, rev=True)
    x_rt = unpad_activations(xr, dims, size_1=SIZE_1, size_2=SIZE_2, batch=B)
    jax.block_until_ready(x_rt)
    assert jnp.allclose(x_rt, x, atol=1e-3, rtol=1e-3)

    # --- bf16 default path (bf16 weights + bf16 activation slabs) ------------
    packed_bf16, dims_bf = pack_inv_layer_params(
        raw, size_1=SIZE_1, size_2=SIZE_2, hidden=HIDDEN)   # default bf16
    out_bf, jac_bf = inv_layer_forward(
        x, packed_bf16, dims_bf, size_1=SIZE_1, size_2=SIZE_2, clamp=CLAMP,
        rev=False, cal_jacobian=True)
    jax.block_until_ready((out_bf, jac_bf))
    assert jnp.allclose(out_bf.astype(jnp.float32), ref_fwd, atol=0.3, rtol=0.1)
    assert jnp.abs(jac_bf - ref_jac) < 0.5

    print("KERNEL_OK")
</pallas_src>

<mosaic_0001>
module attributes {stable_mosaic.version = 11 : i64} {
  func.func @_inv_layer_kernel(%arg0: i32, %arg1: memref<8x256xf32, #tpu.memory_space<vmem>>, %arg2: memref<128x128xf32, #tpu.memory_space<vmem>>, %arg3: memref<1x128xf32, #tpu.memory_space<vmem>>, %arg4: memref<128x128xf32, #tpu.memory_space<vmem>>, %arg5: memref<1x128xf32, #tpu.memory_space<vmem>>, %arg6: memref<128x256xf32, #tpu.memory_space<vmem>>, %arg7: memref<1x256xf32, #tpu.memory_space<vmem>>, %arg8: memref<128x128xf32, #tpu.memory_space<vmem>>, %arg9: memref<1x128xf32, #tpu.memory_space<vmem>>, %arg10: memref<128x128xf32, #tpu.memory_space<vmem>>, %arg11: memref<1x128xf32, #tpu.memory_space<vmem>>, %arg12: memref<8x256xf32, #tpu.memory_space<vmem>>, %arg13: memref<1x8x128xf32, #tpu.memory_space<vmem>>) attributes {dimension_semantics = [#tpu.dimension_semantics<parallel>], iteration_bounds = array<i64: 1>, scalar_prefetch = 0 : i64, scratch_operands = 0 : i64, tpu.core_type = #tpu.core_type<tc>, window_params = [{transform_indices = @transform_0, window_bounds = array<i64: 8, 256>}, {pipeline_mode = #tpu.pipeline_mode<synchronous>, transform_indices = @transform_1, window_bounds = array<i64: 128, 128>}, {pipeline_mode = #tpu.pipeline_mode<synchronous>, transform_indices = @transform_2, window_bounds = array<i64: 1, 128>}, {pipeline_mode = #tpu.pipeline_mode<synchronous>, transform_indices = @transform_3, window_bounds = array<i64: 128, 128>}, {pipeline_mode = #tpu.pipeline_mode<synchronous>, transform_indices = @transform_4, window_bounds = array<i64: 1, 128>}, {pipeline_mode = #tpu.pipeline_mode<synchronous>, transform_indices = @transform_5, window_bounds = array<i64: 128, 256>}, {pipeline_mode = #tpu.pipeline_mode<synchronous>, transform_indices = @transform_6, window_bounds = array<i64: 1, 256>}, {pipeline_mode = #tpu.pipeline_mode<synchronous>, transform_indices = @transform_7, window_bounds = array<i64: 128, 128>}, {pipeline_mode = #tpu.pipeline_mode<synchronous>, transform_indices = @transform_8, window_bounds = array<i64: 1, 128>}, {pipeline_mode = #tpu.pipeline_mode<synchronous>, transform_indices = @transform_9, window_bounds = array<i64: 128, 128>}, {pipeline_mode = #tpu.pipeline_mode<synchronous>, transform_indices = @transform_10, window_bounds = array<i64: 1, 128>}, {transform_indices = @transform_11, window_bounds = array<i64: 8, 256>}, {transform_indices = @transform_12, window_bounds = array<i64: 1, 8, 128>}]} {
    %c0 = arith.constant 0 : index
    %c0_0 = arith.constant 0 : index
    %0 = vector.load %arg1[%c0, %c0_0] : memref<8x256xf32, #tpu.memory_space<vmem>>, vector<8x256xf32>
    %1 = vector.extract_strided_slice %0 {offsets = [0, 0], sizes = [8, 128], strides = [1, 1]} : vector<8x256xf32> to vector<8x128xf32>
    %2 = vector.extract_strided_slice %0 {offsets = [0, 128], sizes = [8, 128], strides = [1, 1]} : vector<8x256xf32> to vector<8x128xf32>
    %c0_1 = arith.constant 0 : index
    %c0_2 = arith.constant 0 : index
    %3 = vector.load %arg3[%c0_1, %c0_2] : memref<1x128xf32, #tpu.memory_space<vmem>>, vector<1x128xf32>
    %c0_3 = arith.constant 0 : index
    %c0_4 = arith.constant 0 : index
    %4 = vector.load %arg5[%c0_3, %c0_4] : memref<1x128xf32, #tpu.memory_space<vmem>>, vector<1x128xf32>
    %c0_5 = arith.constant 0 : index
    %c0_6 = arith.constant 0 : index
    %5 = vector.load %arg7[%c0_5, %c0_6] : memref<1x256xf32, #tpu.memory_space<vmem>>, vector<1x256xf32>
    %c0_7 = arith.constant 0 : index
    %c0_8 = arith.constant 0 : index
    %6 = vector.load %arg9[%c0_7, %c0_8] : memref<1x128xf32, #tpu.memory_space<vmem>>, vector<1x128xf32>
    %c0_9 = arith.constant 0 : index
    %c0_10 = arith.constant 0 : index
    %7 = vector.load %arg11[%c0_9, %c0_10] : memref<1x128xf32, #tpu.memory_space<vmem>>, vector<1x128xf32>
    %c0_11 = arith.constant 0 : index
    %c0_12 = arith.constant 0 : index
    %8 = vector.load %arg6[%c0_11, %c0_12] : memref<128x256xf32, #tpu.memory_space<vmem>>, vector<128x256xf32>
    %cst = arith.constant dense<0.000000e+00> : vector<8x256xf32>
    %9 = tpu.matmul %1, %8, %cst {dimension_numbers = #tpu.dot_dimension_numbers<[1], [0], [0], [1], [0, 0, 1, 1], [], []>} : vector<8x128xf32>, vector<128x256xf32>, vector<8x256xf32> -> vector<8x256xf32>
    %10 = vector.broadcast %5 : vector<1x256xf32> to vector<8x256xf32>
    %11 = arith.addf %9, %10 : vector<8x256xf32>
    %cst_13 = arith.constant 0.000000e+00 : f32
    %12 = vector.broadcast %cst_13 : f32 to vector<8x256xf32>
    %13 = arith.cmpf oge, %11, %12 : vector<8x256xf32>
    %cst_14 = arith.constant 2.000000e-01 : f32
    %14 = vector.broadcast %cst_14 : f32 to vector<8x256xf32>
    %15 = arith.mulf %14, %11 : vector<8x256xf32>
    %16 = arith.select %13, %11, %15 : vector<8x256xi1>, vector<8x256xf32>
    %17 = vector.extract_strided_slice %16 {offsets = [0, 0], sizes = [8, 128], strides = [1, 1]} : vector<8x256xf32> to vector<8x128xf32>
    %c0_15 = arith.constant 0 : index
    %c0_16 = arith.constant 0 : index
    %18 = vector.load %arg8[%c0_15, %c0_16] : memref<128x128xf32, #tpu.memory_space<vmem>>, vector<128x128xf32>
    %cst_17 = arith.constant dense<0.000000e+00> : vector<8x128xf32>
    %19 = tpu.matmul %17, %18, %cst_17 {dimension_numbers = #tpu.dot_dimension_numbers<[1], [0], [0], [1], [0, 0, 1, 1], [], []>} : vector<8x128xf32>, vector<128x128xf32>, vector<8x128xf32> -> vector<8x128xf32>
    %20 = vector.broadcast %6 : vector<1x128xf32> to vector<8x128xf32>
    %21 = arith.addf %19, %20 : vector<8x128xf32>
    %22 = vector.extract_strided_slice %16 {offsets = [0, 128], sizes = [8, 128], strides = [1, 1]} : vector<8x256xf32> to vector<8x128xf32>
    %c0_18 = arith.constant 0 : index
    %c0_19 = arith.constant 0 : index
    %23 = vector.load %arg10[%c0_18, %c0_19] : memref<128x128xf32, #tpu.memory_space<vmem>>, vector<128x128xf32>
    %cst_20 = arith.constant dense<0.000000e+00> : vector<8x128xf32>
    %24 = tpu.matmul %22, %23, %cst_20 {dimension_numbers = #tpu.dot_dimension_numbers<[1], [0], [0], [1], [0, 0, 1, 1], [], []>} : vector<8x128xf32>, vector<128x128xf32>, vector<8x128xf32> -> vector<8x128xf32>
    %25 = vector.broadcast %7 : vector<1x128xf32> to vector<8x128xf32>
    %26 = arith.addf %24, %25 : vector<8x128xf32>
    %27 = arith.negf %21 : vector<8x128xf32>
    %28 = math.exp %27 : vector<8x128xf32>
    %cst_21 = arith.constant 1.000000e+00 : f32
    %29 = vector.broadcast %cst_21 : f32 to vector<8x128xf32>
    %30 = arith.addf %29, %28 : vector<8x128xf32>
    %31 = arith.divf %29, %30 : vector<8x128xf32>
    %cst_22 = arith.constant 2.000000e+00 : f32
    %32 = vector.broadcast %cst_22 : f32 to vector<8x128xf32>
    %33 = arith.mulf %31, %32 : vector<8x128xf32>
    %cst_23 = arith.constant 1.000000e+00 : f32
    %34 = vector.broadcast %cst_23 : f32 to vector<8x128xf32>
    %35 = arith.subf %33, %34 : vector<8x128xf32>
    %cst_24 = arith.constant 1.000000e+00 : f32
    %36 = vector.broadcast %cst_24 : f32 to vector<8x128xf32>
    %37 = arith.mulf %36, %35 : vector<8x128xf32>
    %38 = arith.subf %2, %26 : vector<8x128xf32>
    %cst_25 = arith.constant 0.000000e+00 : f32
    %39 = vector.broadcast %cst_25 : f32 to vector<8x128xf32>
    %40 = arith.subf %39, %37 : vector<8x128xf32>
    %41 = math.exp %40 : vector<8x128xf32>
    %42 = arith.mulf %38, %41 : vector<8x128xf32>
    %c0_26 = arith.constant 0 : index
    %c0_27 = arith.constant 0 : index
    %43 = vector.load %arg2[%c0_26, %c0_27] : memref<128x128xf32, #tpu.memory_space<vmem>>, vector<128x128xf32>
    %cst_28 = arith.constant dense<0.000000e+00> : vector<8x128xf32>
    %44 = tpu.matmul %42, %43, %cst_28 {dimension_numbers = #tpu.dot_dimension_numbers<[1], [0], [0], [1], [0, 0, 1, 1], [], []>} : vector<8x128xf32>, vector<128x128xf32>, vector<8x128xf32> -> vector<8x128xf32>
    %45 = vector.broadcast %3 : vector<1x128xf32> to vector<8x128xf32>
    %46 = arith.addf %44, %45 : vector<8x128xf32>
    %cst_29 = arith.constant 0.000000e+00 : f32
    %47 = vector.broadcast %cst_29 : f32 to vector<8x128xf32>
    %48 = arith.cmpf oge, %46, %47 : vector<8x128xf32>
    %cst_30 = arith.constant 2.000000e-01 : f32
    %49 = vector.broadcast %cst_30 : f32 to vector<8x128xf32>
    %50 = arith.mulf %49, %46 : vector<8x128xf32>
    %51 = arith.select %48, %46, %50 : vector<8x128xi1>, vector<8x128xf32>
    %c0_31 = arith.constant 0 : index
    %c0_32 = arith.constant 0 : index
    %52 = vector.load %arg4[%c0_31, %c0_32] : memref<128x128xf32, #tpu.memory_space<vmem>>, vector<128x128xf32>
    %cst_33 = arith.constant dense<0.000000e+00> : vector<8x128xf32>
    %53 = tpu.matmul %51, %52, %cst_33 {dimension_numbers = #tpu.dot_dimension_numbers<[1], [0], [0], [1], [0, 0, 1, 1], [], []>} : vector<8x128xf32>, vector<128x128xf32>, vector<8x128xf32> -> vector<8x128xf32>
    %54 = vector.broadcast %4 : vector<1x128xf32> to vector<8x128xf32>
    %55 = arith.addf %53, %54 : vector<8x128xf32>
    %56 = arith.subf %1, %55 : vector<8x128xf32>
    %c0_34 = arith.constant 0 : index
    %c0_35 = arith.constant 0 : index
    %57 = vector.load %arg12[%c0_34, %c0_35] : memref<8x256xf32, #tpu.memory_space<vmem>>, vector<8x128xf32>
    tpu.vector_store %arg12[%c0_34, %c0_35], %56 {strides = array<i32>} : memref<8x256xf32, #tpu.memory_space<vmem>>, vector<8x128xf32>,
    %c0_36 = arith.constant 0 : index
    %c128 = arith.constant 128 : index
    %58 = vector.load %arg12[%c0_36, %c128] : memref<8x256xf32, #tpu.memory_space<vmem>>, vector<8x128xf32>
    tpu.vector_store %arg12[%c0_36, %c128], %42 {strides = array<i32>} : memref<8x256xf32, #tpu.memory_space<vmem>>, vector<8x128xf32>,
    %59 = vector.shape_cast %37 : vector<8x128xf32> to vector<1x8x128xf32>
    %cst_37 = arith.constant dense<0.000000e+00> : vector<1xf32>
    %60 = vector.multi_reduction <add>, %59, %cst_37 [1, 2] : vector<1x8x128xf32> to vector<1xf32>
    %61 = vector.shape_cast %60 : vector<1xf32> to vector<1x1x1xf32>
    %62 = vector.extract %61[0, 0, 0] : f32 from vector<1x1x1xf32>
    %cst_38 = arith.constant 1.000000e+00 : f32
    %63 = arith.mulf %cst_38, %62 : f32
    %64 = vector.broadcast %63 : f32 to vector<1x8x128xf32>
    %c0_39 = arith.constant 0 : index
    %c0_40 = arith.constant 0 : index
    %c0_41 = arith.constant 0 : index
    %65 = vector.load %arg13[%c0_39, %c0_40, %c0_41] : memref<1x8x128xf32, #tpu.memory_space<vmem>>, vector<1x8x128xf32>
    tpu.vector_store %arg13[%c0_39, %c0_40, %c0_41], %64 {strides = array<i32>} : memref<1x8x128xf32, #tpu.memory_space<vmem>>, vector<1x8x128xf32>,
    return
  }
  func.func @transform_0(%arg0: i32) -> (i32, i32) {
    %c0_i32 = arith.constant 0 : i32
    %c0_i32_0 = arith.constant 0 : i32
    return %arg0, %c0_i32 : i32, i32
  }
  func.func @transform_1(%arg0: i32) -> (i32, i32) {
    %c0_i32 = arith.constant 0 : i32
    %c0_i32_0 = arith.constant 0 : i32
    %c0_i32_1 = arith.constant 0 : i32
    return %c0_i32, %c0_i32_0 : i32, i32
  }
  func.func @transform_2(%arg0: i32) -> (i32, i32) {
    %c0_i32 = arith.constant 0 : i32
    %c0_i32_0 = arith.constant 0 : i32
    %c0_i32_1 = arith.constant 0 : i32
    return %c0_i32, %c0_i32_0 : i32, i32
  }
  func.func @transform_3(%arg0: i32) -> (i32, i32) {
    %c0_i32 = arith.constant 0 : i32
    %c0_i32_0 = arith.constant 0 : i32
    %c0_i32_1 = arith.constant 0 : i32
    return %c0_i32, %c0_i32_0 : i32, i32
  }
  func.func @transform_4(%arg0: i32) -> (i32, i32) {
    %c0_i32 = arith.constant 0 : i32
    %c0_i32_0 = arith.constant 0 : i32
    %c0_i32_1 = arith.constant 0 : i32
    return %c0_i32, %c0_i32_0 : i32, i32
  }
  func.func @transform_5(%arg0: i32) -> (i32, i32) {
    %c0_i32 = arith.constant 0 : i32
    %c0_i32_0 = arith.constant 0 : i32
    %c0_i32_1 = arith.constant 0 : i32
    return %c0_i32, %c0_i32_0 : i32, i32
  }
  func.func @transform_6(%arg0: i32) -> (i32, i32) {
    %c0_i32 = arith.constant 0 : i32
    %c0_i32_0 = arith.constant 0 : i32
    %c0_i32_1 = arith.constant 0 : i32
    return %c0_i32, %c0_i32_0 : i32, i32
  }
  func.func @transform_7(%arg0: i32) -> (i32, i32) {
    %c0_i32 = arith.constant 0 : i32
    %c0_i32_0 = arith.constant 0 : i32
    %c0_i32_1 = arith.constant 0 : i32
    return %c0_i32, %c0_i32_0 : i32, i32
  }
  func.func @transform_8(%arg0: i32) -> (i32, i32) {
    %c0_i32 = arith.constant 0 : i32
    %c0_i32_0 = arith.constant 0 : i32
    %c0_i32_1 = arith.constant 0 : i32
    return %c0_i32, %c0_i32_0 : i32, i32
  }
  func.func @transform_9(%arg0: i32) -> (i32, i32) {
    %c0_i32 = arith.constant 0 : i32
    %c0_i32_0 = arith.constant 0 : i32
    %c0_i32_1 = arith.constant 0 : i32
    return %c0_i32, %c0_i32_0 : i32, i32
  }
  func.func @transform_10(%arg0: i32) -> (i32, i32) {
    %c0_i32 = arith.constant 0 : i32
    %c0_i32_0 = arith.constant 0 : i32
    %c0_i32_1 = arith.constant 0 : i32
    return %c0_i32, %c0_i32_0 : i32, i32
  }
  func.func @transform_11(%arg0: i32) -> (i32, i32) {
    %c0_i32 = arith.constant 0 : i32
    %c0_i32_0 = arith.constant 0 : i32
    return %arg0, %c0_i32 : i32, i32
  }
  func.func @transform_12(%arg0: i32) -> (i32, i32, i32) {
    %c0_i32 = arith.constant 0 : i32
    %c0_i32_0 = arith.constant 0 : i32
    %c0_i32_1 = arith.constant 0 : i32
    return %arg0, %c0_i32, %c0_i32_0 : i32, i32, i32
  }
}

</mosaic_0001>

<bundles_post_ra>
// kernel: tpu_custom_call.1
= control target key start
LH: loop header
LB: loop body
LE: loop exit
PB: predicated region body
PF: predicated region fallthrough
CT: control target
= control target key end

     0   :  { %18 = vsyncpa [#allocation3], 0  ;;  %s1494_s0 = inlined_call_operand.hbm [shape: f32[8,256], index: 0, kind: input, shape index: {}]   ;;  %s1495_s1 = inlined_call_operand.hbm [shape: f32[128,128], index: 1, kind: input, shape index: {}]   ;;  %s1496_s2 = inlined_call_operand.vmem [shape: f32[1,128], index: 2, kind: input, shape index: {}]   ;;  %s1497_s3 = inlined_call_operand.hbm [shape: f32[128,128], index: 3, kind: input, shape index: {}]   ;;  %s1498_s4 = inlined_call_operand.vmem [shape: f32[1,128], index: 4, kind: input, shape index: {}]   ;;  %s1499_s5 = inlined_call_operand.hbm [shape: f32[128,256], index: 5, kind: input, shape index: {}]   ;;  %s1500_s6 = inlined_call_operand.vmem [shape: f32[1,256], index: 6, kind: input, shape index: {}]   ;;  %s1501_s7 = inlined_call_operand.hbm [shape: f32[128,128], index: 7, kind: input, shape index: {}]   ;;  %s1502_s8 = inlined_call_operand.vmem [shape: f32[1,128], index: 8, kind: input, shape index: {}]   ;;  %s1503_s9 = inlined_call_operand.hbm [shape: f32[128,128], index: 9, kind: input, shape index: {}]   ;;  %s1504_s10 = inlined_call_operand.vmem [shape: f32[1,128], index: 10, kind: input, shape index: {}]   ;;  %s1505_s11 = inlined_call_operand.hbm [shape: f32[8,256], index: 11, kind: output, shape index: {0}]   ;;  %s1506_s12 = inlined_call_operand.hbm [shape: f32[1,8,128], index: 12, kind: output, shape index: {1}]  }
   0x1   :  { %19 = vsyncpa [#allocation6], 0 }
   0x2   :  { %20 = vsyncpa [#allocation9], 0 }
   0x3   :  { %21 = vsyncpa [#allocation12], 0 }
   0x4   :  { %22 = vsyncpa [#allocation4], 0 }
   0x5   :  { %23 = vsyncpa [#allocation15], 0  ;;  %s1232_s21 = smov [#allocation5]   ;;  %s1044_s25 = scalar_lea.hbm %s1495_s1, 2048 }
   0x6   :  { %s39_s22 = sshll.u32 %s1232_s21, 4  ;;  %p1045_p0 = scmp.ne.s32.totalorder %s1495_s1, %s1044_s25  ;;  %s40_s22 = int_to_ptr.vmem [resolvable:$true] %s39_s22 }
   0x7   :  { %p1048_p1 = scmp.lt.u32.totalorder %s1044_s25, %s1495_s1 }
   0x9   :  { %p1050_p2 = pnand %p1048_p1, %p1045_p0 }
   0xb   :  { %1053 = shalt.err (!%p1050_p2)
}
   0xc   :  { %s1054_s30 = scalar_lea.vmem %s40_s22, 2048  ;;  %p1059_p4 = scmp.lt.s32.totalorder %s40_s22, %s40_s22 }
   0xd   :  { %p1055_p3 = scmp.ne.s32.totalorder %s40_s22, %s1054_s30  ;;  %p1060_p5 = scmp.lt.s32.totalorder %s1054_s30, %s1054_s30 }
   0xf   :  { %p1061_p6 = por %p1060_p5, %p1059_p4 }
  0x11   :  { %p1062_p7 = pnand %p1061_p6, %p1055_p3 }
  0x13   :  { %1065 = shalt.err (!%p1062_p7)
}
  0x14   :  { %s1233_s13 = smov 128   ;;  %s1234_s14 = smov 8  }
  0x15   :  { %45 = dma.hbm_to_vmem [thread:$0]  %s1495_s1, 2048, %s40_s22, [#allocation6], %s1233_s13, %s1233_s13, %s1234_s14  }
  0x16   :  { %s1235_s17 = smov [#allocation8]   ;;  %s1066_s21 = scalar_lea.hbm %s1499_s5, 4096 }
  0x17   :  { %s67_s18 = sshll.u32 %s1235_s17, 4  ;;  %p1067_p8 = scmp.ne.s32.totalorder %s1499_s5, %s1066_s21  ;;  %s68_s18 = int_to_ptr.vmem [resolvable:$true] %s67_s18 }
  0x18   :  { %p1070_p9 = scmp.lt.u32.totalorder %s1066_s21, %s1499_s5 }
  0x1a   :  { %p1072_p10 = pnand %p1070_p9, %p1067_p8 }
  0x1c   :  { %1075 = shalt.err (!%p1072_p10)
}
  0x1d   :  { %s1076_s27 = scalar_lea.vmem %s68_s18, 4096  ;;  %p1081_p12 = scmp.lt.s32.totalorder %s68_s18, %s68_s18 }
  0x1e   :  { %p1077_p11 = scmp.ne.s32.totalorder %s68_s18, %s1076_s27  ;;  %p1082_p13 = scmp.lt.s32.totalorder %s1076_s27, %s1076_s27 }
  0x20   :  { %p1083_p0 = por %p1082_p13, %p1081_p12 }
  0x22   :  { %p1084_p1 = pnand %p1083_p0, %p1077_p11 }
  0x24   :  { %1087 = shalt.err (!%p1084_p1)
}
  0x25   :  { %s1236_s1 = smov 256   ;;  %s1237_s22 = smov 16  }
  0x26   :  { %73 = dma.hbm_to_vmem [thread:$0]  %s1499_s5, 4096, %s68_s18, [#allocation9], %s1236_s1, %s1236_s1, %s1237_s22  }
  0x27   :  { %s1238_s30 = smov [#allocation2]   ;;  %s1239_s16 = smov [#allocation7]  }
  0x28   :  { %s30_s15 = sshll.u32 %s1238_s30, 4  ;;  %s53_s17 = sshll.u32 %s1239_s16, 4  ;;  %s31_s15 = int_to_ptr.vmem [resolvable:$true] %s30_s15  ;;  %s1339_s17 = int_to_ptr.vmem [resolvable:$true] %s53_s17 }
  0x29   :  { %s1088_s21 = scalar_lea.hbm %s1494_s0, 256 }
  0x2a   :  { %p1089_p2 = scmp.ne.s32.totalorder %s1494_s0, %s1088_s21  ;;  %p1092_p3 = scmp.lt.u32.totalorder %s1088_s21, %s1494_s0 }
  0x2c   :  { %p1094_p4 = pnand %p1092_p3, %p1089_p2 }
  0x2e   :  { %1097 = shalt.err (!%p1094_p4)
}
  0x2f   :  { %s1098_s5 = scalar_lea.vmem %s31_s15, 256  ;;  %p1103_p6 = scmp.lt.s32.totalorder %s31_s15, %s31_s15 }
  0x30   :  { %p1099_p5 = scmp.ne.s32.totalorder %s31_s15, %s1098_s5  ;;  %p1104_p7 = scmp.lt.s32.totalorder %s1098_s5, %s1098_s5 }
  0x32   :  { %p1105_p8 = por %p1104_p7, %p1103_p6 }
  0x34   :  { %p1106_p9 = pnand %p1105_p8, %p1099_p5 }
  0x36   :  { %1109 = shalt.err (!%p1106_p9)
}
  0x37   :  { %33 = dma.hbm_to_vmem [thread:$0]  %s1494_s0, 256, %s31_s15, [#allocation3]  }
  0x38   :  { %s1110_s28 = scalar_lea.hbm %s1497_s3, 2048 }
  0x39   :  { %p1111_p10 = scmp.ne.s32.totalorder %s1497_s3, %s1110_s28  ;;  %p1114_p11 = scmp.lt.u32.totalorder %s1110_s28, %s1497_s3 }
  0x3b   :  { %p1116_p12 = pnand %p1114_p11, %p1111_p10 }
  0x3d   :  { %1119 = shalt.err (!%p1116_p12)
}
  0x3e   :  { %s1120_s20 = scalar_lea.vmem %s1339_s17, 2048  ;;  %p1125_p0 = scmp.lt.s32.totalorder %s1339_s17, %s1339_s17 }
  0x3f   :  { %p1121_p13 = scmp.ne.s32.totalorder %s1339_s17, %s1120_s20  ;;  %p1126_p1 = scmp.lt.s32.totalorder %s1120_s20, %s1120_s20 }
  0x41   :  { %p1127_p2 = por %p1126_p1, %p1125_p0 }
  0x43   :  { %p1128_p3 = pnand %p1127_p2, %p1121_p13 }
  0x45   :  { %1131 = shalt.err (!%p1128_p3)
}
  0x46   :  { %59 = dma.hbm_to_vmem [thread:$0]  %s1497_s3, 2048, %s1339_s17, [#allocation6], %s1233_s13, %s1233_s13, %s1234_s14  }
  0x47   :  { %s1240_s21 = smov [#allocation10]   ;;  %s1241_s24 = smov [#allocation11]  }
  0x48   :  { %s81_s23 = sshll.u32 %s1240_s21, 4  ;;  %s95_s25 = sshll.u32 %s1241_s24, 4  ;;  %s82_s23 = int_to_ptr.vmem [resolvable:$true] %s81_s23  ;;  %s1373_s25 = int_to_ptr.vmem [resolvable:$true] %s95_s25 }
  0x49   :  { %s1132_s18 = scalar_lea.hbm %s1501_s7, 2048 }
  0x4a   :  { %p1133_p4 = scmp.ne.s32.totalorder %s1501_s7, %s1132_s18  ;;  %p1136_p5 = scmp.lt.u32.totalorder %s1132_s18, %s1501_s7 }
  0x4c   :  { %p1138_p6 = pnand %p1136_p5, %p1133_p4 }
  0x4e   :  { %1141 = shalt.err (!%p1138_p6)
}
  0x4f   :  { %s1142_s3 = scalar_lea.vmem %s82_s23, 2048  ;;  %p1147_p8 = scmp.lt.s32.totalorder %s82_s23, %s82_s23 }
  0x50   :  { %p1143_p7 = scmp.ne.s32.totalorder %s82_s23, %s1142_s3  ;;  %p1148_p9 = scmp.lt.s32.totalorder %s1142_s3, %s1142_s3 }
  0x52   :  { %p1149_p10 = por %p1148_p9, %p1147_p8 }
  0x54   :  { %p1150_p11 = pnand %p1149_p10, %p1143_p7 }
  0x56   :  { %1153 = shalt.err (!%p1150_p11)
}
  0x57   :  { %87 = dma.hbm_to_vmem [thread:$0]  %s1501_s7, 2048, %s82_s23, [#allocation9], %s1233_s13, %s1233_s13, %s1234_s14  }
  0x58   :  { %s1154_s19 = scalar_lea.hbm %s1503_s9, 2048 }
  0x59   :  { %p1155_p12 = scmp.ne.s32.totalorder %s1503_s9, %s1154_s19  ;;  %p1158_p13 = scmp.lt.u32.totalorder %s1154_s19, %s1503_s9 }
  0x5b   :  { %p1160_p0 = pnand %p1158_p13, %p1155_p12 }
  0x5d   :  { %1163 = shalt.err (!%p1160_p0)
}
  0x5e   :  { %s1164_s24 = scalar_lea.vmem %s1373_s25, 2048  ;;  %p1169_p2 = scmp.lt.s32.totalorder %s1373_s25, %s1373_s25 }
  0x5f   :  { %p1165_p1 = scmp.ne.s32.totalorder %s1373_s25, %s1164_s24  ;;  %p1170_p3 = scmp.lt.s32.totalorder %s1164_s24, %s1164_s24 }
  0x61   :  { %p1171_p4 = por %p1170_p3, %p1169_p2 }
  0x63   :  { %p1172_p5 = pnand %p1171_p4, %p1165_p1 }
  0x65   :  { %1175 = shalt.err (!%p1172_p5)
}
  0x66   :  { %101 = dma.hbm_to_vmem [thread:$0]  %s1503_s9, 2048, %s1373_s25, [#allocation12], %s1233_s13, %s1233_s13, %s1234_s14  }
  0x67   :  { %1220 = dma.done.wait [#allocation3], 256  }
  0x68   :  { %1221 = vsyncadd [#allocation3], 4294967040 }
  0x69   :  { %1222 = dma.done.wait [#allocation6], 4096  }
  0x6a   :  { %1223 = vsyncadd [#allocation6], 4294963200 }
  0x6b   :  { %1224 = dma.done.wait [#allocation9], 6144  }
  0x6c   :  { %1225 = vsyncadd [#allocation9], 4294961152 }
  0x6d   :  { %1226 = dma.done.wait [#allocation12], 2048  }
  0x6e   :  { %1227 = vsyncadd [#allocation12], 4294965248  ;;  %v1242_v0 = vmov 0.0   ;;  %v1243_v1 = vmov 0.0|0.0   ;;  %v130_v2 = vld [vmem:[#allocation8 + $0x8] sm:$0xff]  ;;  %v132_v3 = vld [vmem:[#allocation8 + $0x18] sm:$0xff] }
  0x6f   :  { %236 = vmatprep.mubr.f32.mxu0 %v1242_v0  ;;  %925 = vmatprep.subr.bf16.mxu1 %v1243_v1  ;;  %v129_v4 = vld [vmem:[#allocation8] sm:$0xff]  ;;  %v893_v5 = vpack.c.bf16 %v132_v3, %v130_v2  ;;  %v131_v6 = vld [vmem:[#allocation8 + $0x10] sm:$0xff]  ;;  %v134_v7 = vld [vmem:[#allocation8 + $0x28] sm:$0xff]  ;;  %vm1244_vm0 = vmmov 0   ;;  %s1245_s18 = smov [#allocation14]  }
  0x70   :  { %v136_v8 = vld [vmem:[#allocation8 + $0x38] sm:$0xff]  ;;  %v895_v9 = vpack.c.bf16 %v131_v6, %v129_v4  ;;  %v133_v11 = vld [vmem:[#allocation8 + $0x20] sm:$0xff]  ;;  %v135_v12 = vld [vmem:[#allocation8 + $0x30] sm:$0xff]  ;;  %785 = vmatprep.mubr.msk.f32.mxu1 %vm1244_vm0, %v1242_v0  ;;  %s663_s27 = sshll.u32 %s1245_s18, 4  ;;  %s664_s27 = int_to_ptr.vmem [resolvable:$true] %s663_s27 }
  0x71   :  { %v897_v10 = vpack.c.bf16 %v136_v8, %v134_v7  ;;  %v138_v13 = vld [vmem:[#allocation8 + $0x48] sm:$0xff]  ;;  %894 = vmatprep.subr.bf16.mxu0 %v893_v5  ;;  %v140_v14 = vld [vmem:[#allocation8 + $0x58] sm:$0xff]  ;;  %v899_v15 = vpack.c.bf16 %v135_v12, %v133_v11  ;;  %v137_v17 = vld [vmem:[#allocation8 + $0x40] sm:$0xff]  ;;  %s1176_s1 = scalar_lea.vmem %s664_s27, 128  ;;  %p1181_p7 = scmp.lt.s32.totalorder %s664_s27, %s664_s27 }
  0x72   :  { %896 = vmatpush1.bf16.msra.mxu0 %v895_v9  ;;  %v901_v16 = vpack.c.bf16 %v140_v14, %v138_v13  ;;  %v139_v18 = vld [vmem:[#allocation8 + $0x50] sm:$0xff]  ;;  %v142_v19 = vld [vmem:[#allocation8 + $0x68] sm:$0xff]  ;;  %v144_v20 = vld [vmem:[#allocation8 + $0x78] sm:$0xff]  ;;  %p1177_p6 = scmp.ne.s32.totalorder %s664_s27, %s1176_s1  ;;  %p1182_p8 = scmp.lt.s32.totalorder %s1176_s1, %s1176_s1 }
  0x73   :  { %898 = vmatprep.subr.bf16.mxu0 %v897_v10  ;;  %v903_v21 = vpack.c.bf16 %v139_v18, %v137_v17  ;;  %v905_v22 = vpack.c.bf16 %v144_v20, %v142_v19  ;;  %v141_v23 = vld [vmem:[#allocation8 + $0x60] sm:$0xff]  ;;  %v143_v24 = vld [vmem:[#allocation8 + $0x70] sm:$0xff]  ;;  %v146_v25 = vld [vmem:[#allocation8 + $0x88] sm:$0xff] }
  0x74   :  { %v148_v26 = vld [vmem:[#allocation8 + $0x98] sm:$0xff]  ;;  %v249_v27 = vld [vmem:[#allocation10] sm:$0xff]  ;;  %v250_v28 = vld [vmem:[#allocation10 + $0x8] sm:$0xff]  ;;  %v907_v29 = vpack.c.bf16 %v143_v24, %v141_v23  ;;  %p1183_p9 = por %p1182_p8, %p1181_p7 }
  0x75   :  { %v926_v30 = vpack.c.bf16 %v250_v28, %v249_v27  ;;  %v251_v31 = vld [vmem:[#allocation10 + $0x10] sm:$0xff]  ;;  %v252_v32 = vld [vmem:[#allocation10 + $0x18] sm:$0xff]  ;;  %v909_v33 = vpack.c.bf16 %v148_v26, %v146_v25  ;;  %v145_v34 = vld [vmem:[#allocation8 + $0x80] sm:$0xff] }
  0x76   :  { %900 = vmatpush1.bf16.msra.mxu0 %v899_v15  ;;  %v147_v35 = vld [vmem:[#allocation8 + $0x90] sm:$0xff]  ;;  %v150_v36 = vld [vmem:[#allocation8 + $0xa8] sm:$0xff]  ;;  %v152_v37 = vld [vmem:[#allocation8 + $0xb8] sm:$0xff]  ;;  %v929_v38 = vpack.c.bf16 %v252_v32, %v251_v31  ;;  %p1184_p10 = pnand %p1183_p9, %p1177_p6 }
  0x77   :  { %902 = vmatprep.subr.bf16.mxu0 %v901_v16  ;;  %927 = vmatpush3.bf16.msra.mxu1 %v926_v30  ;;  %v253_v39 = vld [vmem:[#allocation10 + $0x20] sm:$0xff]  ;;  %v254_v40 = vld [vmem:[#allocation10 + $0x28] sm:$0xff]  ;;  %v911_v41 = vpack.c.bf16 %v147_v35, %v145_v34  ;;  %v913_v42 = vpack.c.bf16 %v152_v37, %v150_v36  ;;  %v151_v44 = vld [vmem:[#allocation8 + $0xb0] sm:$0xff]  ;;  %v162_v37 = vlaneseq }
  0x78   :  { %928 = vmatprep.subr.bf16.mxu1 %v1243_v1  ;;  %v149_v43 = vld [vmem:[#allocation8 + $0xa0] sm:$0xff]  ;;  %v154_v45 = vld [vmem:[#allocation8 + $0xc8] sm:$0xff]  ;;  %v156_v46 = vld [vmem:[#allocation8 + $0xd8] sm:$0xff]  ;;  %v932_v47 = vpack.c.bf16 %v254_v40, %v253_v39 }
  0x79   :  { %v255_v48 = vld [vmem:[#allocation10 + $0x30] sm:$0xff]  ;;  %v256_v49 = vld [vmem:[#allocation10 + $0x38] sm:$0xff]  ;;  %v915_v50 = vpack.c.bf16 %v151_v44, %v149_v43  ;;  %v917_v51 = vpack.c.bf16 %v156_v46, %v154_v45  ;;  %v153_v52 = vld [vmem:[#allocation8 + $0xc0] sm:$0xff] }
  0x7a   :  { %904 = vmatpush1.bf16.msra.mxu0 %v903_v21  ;;  %v155_v53 = vld [vmem:[#allocation8 + $0xd0] sm:$0xff]  ;;  %v158_v54 = vld [vmem:[#allocation8 + $0xe8] sm:$0xff]  ;;  %v160_v55 = vld [vmem:[#allocation8 + $0xf8] sm:$0xff]  ;;  %v935_v56 = vpack.c.bf16 %v256_v49, %v255_v48 }
  0x7b   :  { %906 = vmatprep.subr.bf16.mxu0 %v905_v22  ;;  %930 = vmatpush3.bf16.msra.mxu1 %v929_v38  ;;  %v257_v57 = vld [vmem:[#allocation10 + $0x40] sm:$0xff]  ;;  %v258_v58 = vld [vmem:[#allocation10 + $0x48] sm:$0xff]  ;;  %v919_v59 = vpack.c.bf16 %v155_v53, %v153_v52  ;;  %v921_v60 = vpack.c.bf16 %v160_v55, %v158_v54  ;;  %v159_v62 = vld [vmem:[#allocation8 + $0xf0] sm:$0xff]  ;;  %v163_v38 = vshrl.u32 %v162_v37, 7 }
  0x7c   :  { %931 = vmatprep.subr.bf16.mxu1 %v1243_v1  ;;  %v157_v61 = vld [vmem:[#allocation8 + $0xe0] sm:$0xff]  ;;  %v938_v63 = vpack.c.bf16 %v258_v58, %v257_v57  ;;  %v259_v2 = vld [vmem:[#allocation10 + $0x50] sm:$0xff]  ;;  %v260_v3 = vld [vmem:[#allocation10 + $0x58] sm:$0xff] }
  0x7d   :  { %v923_v4 = vpack.c.bf16 %v159_v62, %v157_v61  ;;  %v341_v5 = vld [vmem:[#allocation11] sm:$0xff]  ;;  %v342_v6 = vld [vmem:[#allocation11 + $0x8] sm:$0xff]  ;;  %v941_v7 = vpack.c.bf16 %v260_v3, %v259_v2  ;;  %v1417_v10 = vld [vmem:[#allocation2] sm:$0xff]  ;;  %v164_v39 = vsub.s32 0, %v163_v38 }
  0x7e   :  { %908 = vmatpush1.bf16.msra.mxu0 %v907_v29  ;;  %v261_v8 = vld [vmem:[#allocation10 + $0x60] sm:$0xff]  ;;  %v262_v9 = vld [vmem:[#allocation10 + $0x68] sm:$0xff]  ;;  %v950_v11 = vpack.c.bf16 %v342_v6, %v341_v5  ;;  %v343_v12 = vld [vmem:[#allocation11 + $0x10] sm:$0xff] }
  0x7f   :  { %910 = vmatprep.subr.bf16.mxu0 %v909_v33  ;;  %933 = vmatpush3.bf16.msra.mxu1 %v932_v47  ;;  %v344_v13 = vld [vmem:[#allocation11 + $0x18] sm:$0xff]  ;;  %v944_v14 = vpack.c.bf16 %v262_v9, %v261_v8  ;;  %v345_v16 = vld [vmem:[#allocation11 + $0x20] sm:$0xff]  ;;  %v346_v17 = vld [vmem:[#allocation11 + $0x28] sm:$0xff] }
  0x80   :  { %934 = vmatprep.subr.bf16.mxu1 %v1243_v1  ;;  %v953_v15 = vpack.c.bf16 %v344_v13, %v343_v12  ;;  %v956_v18 = vpack.c.bf16 %v346_v17, %v345_v16  ;;  %v347_v19 = vld [vmem:[#allocation11 + $0x30] sm:$0xff]  ;;  %v348_v20 = vld [vmem:[#allocation11 + $0x38] sm:$0xff]  ;;  %v349_v22 = vld [vmem:[#allocation11 + $0x40] sm:$0xff] }
  0x81   :  { %v959_v21 = vpack.c.bf16 %v348_v20, %v347_v19  ;;  %v350_v23 = vld [vmem:[#allocation11 + $0x48] sm:$0xff]  ;;  %v351_v25 = vld [vmem:[#allocation11 + $0x50] sm:$0xff]  ;;  %v352_v26 = vld [vmem:[#allocation11 + $0x58] sm:$0xff] }
  0x82   :  { %912 = vmatpush1.bf16.msra.mxu0 %v911_v41  ;;  %v962_v24 = vpack.c.bf16 %v350_v23, %v349_v22  ;;  %v965_v27 = vpack.c.bf16 %v352_v26, %v351_v25  ;;  %v353_v28 = vld [vmem:[#allocation11 + $0x60] sm:$0xff]  ;;  %v354_v29 = vld [vmem:[#allocation11 + $0x68] sm:$0xff]  ;;  %v263_v31 = vld [vmem:[#allocation10 + $0x70] sm:$0xff]  ;;  %v168_v41 = vsub.s32 1, %v163_v38 }
  0x83   :  { %914 = vmatprep.subr.bf16.mxu0 %v913_v42  ;;  %936 = vmatpush3.bf16.msra.mxu1 %v935_v56  ;;  %v968_v30 = vpack.c.bf16 %v354_v29, %v353_v28  ;;  %v264_v32 = vld [vmem:[#allocation10 + $0x78] sm:$0xff]  ;;  %v355_v34 = vld [vmem:[#allocation11 + $0x70] sm:$0xff]  ;;  %v446_v52 = vld [vmem:[#allocation5] sm:$0xff] }
  0x84   :  { %937 = vmatprep.subr.bf16.mxu1 %v1243_v1  ;;  %v947_v33 = vpack.c.bf16 %v264_v32, %v263_v31  ;;  %v356_v35 = vld [vmem:[#allocation11 + $0x78] sm:$0xff]  ;;  %v126_v40 = vld [vmem:[%s1500_s6] sm:$0x3]  ;;  %v447_v53 = vld [vmem:[#allocation5 + $0x8] sm:$0xff] }
  0x85   :  { %v971_v36 = vpack.c.bf16 %v356_v35, %v355_v34  ;;  %v165_v42 = vrot.slane %v126_v40, %v164_v39  ;;  %v169_v43 = vrot.slane %v126_v40, %v168_v41  ;;  %v448_v54 = vld [vmem:[#allocation5 + $0x10] sm:$0xff]  ;;  %v974_v55 = vpack.c.bf16 %v447_v53, %v446_v52  ;;  %v449_v56 = vld [vmem:[#allocation5 + $0x18] sm:$0xff]  ;;  %v450_v58 = vld [vmem:[#allocation5 + $0x20] sm:$0xff] }
  0x86   :  { %916 = vmatpush1.bf16.msra.mxu0 %v915_v50  ;;  %v977_v57 = vpack.c.bf16 %v449_v56, %v448_v54  ;;  %v452_v61 = vld [vmem:[#allocation5 + $0x30] sm:$0xff]  ;;  %v453_v62 = vld [vmem:[#allocation5 + $0x38] sm:$0xff]  ;;  %v455_v2 = vld [vmem:[#allocation5 + $0x48] sm:$0xff] }
  0x87   :  { %918 = vmatprep.subr.bf16.mxu0 %v917_v51  ;;  %939 = vmatpush3.bf16.msra.mxu1 %v938_v63  ;;  %v983_v63 = vpack.c.bf16 %v453_v62, %v452_v61  ;;  %v457_v5 = vld [vmem:[#allocation5 + $0x58] sm:$0xff]  ;;  %v459_v8 = vld [vmem:[#allocation5 + $0x68] sm:$0xff]  ;;  %v680_v28 = vld [vmem:[%s1504_s10] ss:$0 sm:$0xff] }
  0x88   :  { %940 = vmatprep.subr.bf16.mxu1 %v1243_v1  ;;  %v461_v12 = vld [vmem:[#allocation5 + $0x78] sm:$0xff]  ;;  %v541_v34 = vld [vmem:[#allocation7] sm:$0xff]  ;;  %v542_v35 = vld [vmem:[#allocation7 + $0x8] sm:$0xff] }
  0x89   :  { %v543_v37 = vld [vmem:[#allocation7 + $0x10] sm:$0xff]  ;;  %v544_v38 = vld [vmem:[#allocation7 + $0x18] sm:$0xff]  ;;  %v545_v40 = vld [vmem:[#allocation7 + $0x20] sm:$0xff] }
  0x8a   :  { %920 = vmatpush1.bf16.msra.mxu0 %v919_v59  ;;  %v451_v59 = vld [vmem:[#allocation5 + $0x28] sm:$0xff]  ;;  %v1001_v39 = vpack.c.bf16 %v544_v38, %v543_v37  ;;  %v553_v52 = vld [vmem:[#allocation7 + $0x60] sm:$0xff]  ;;  %v556_v56 = vld [vmem:[#allocation7 + $0x78] sm:$0xff] }
  0x8b   :  { %922 = vmatprep.subr.bf16.mxu0 %v921_v60  ;;  %942 = vmatpush3.bf16.msra.mxu1 %v941_v7  ;;  %v980_v60 = vpack.c.bf16 %v451_v59, %v450_v58  ;;  %v458_v7 = vld [vmem:[#allocation5 + $0x60] sm:$0xff]  ;;  %v546_v41 = vld [vmem:[#allocation7 + $0x28] sm:$0xff] }
  0x8c   :  { %943 = vmatprep.subr.bf16.mxu1 %v1243_v1  ;;  %v992_v9 = vpack.c.bf16 %v459_v8, %v458_v7  ;;  %v554_v53 = vld [vmem:[#allocation7 + $0x68] sm:$0xff] }
  0x8d   :  { %v1016_v54 = vpack.c.bf16 %v554_v53, %v553_v52 }
  0x8e   :  { %924 = vmatpush1.bf16.msra.mxu0 %v923_v4  ;;  %v456_v4 = vld [vmem:[#allocation5 + $0x50] sm:$0xff] }
  0x8f   :  { %949 = vmatprep.subr.bf16.mxu0 %v1243_v1  ;;  %945 = vmatpush3.bf16.msra.mxu1 %v944_v14  ;;  %v989_v6 = vpack.c.bf16 %v457_v5, %v456_v4  ;;  %v679_v14 = vld [vmem:[%s1502_s8] ss:$0 sm:$0xff] }
  0x90   :  { %946 = vmatprep.subr.bf16.mxu1 %v1243_v1 }
  0x91   :  { %237 = vmatmul.mubr.f32.vlgmr.msra.gmra.mrb[0].mxu0 %v1417_v10 }
  0x92   :  { %951 = vmatpush3.bf16.msra.mxu0 %v950_v11  ;;  %820 = vmatprep.mubr.msk.f32.mxu0 %vm1244_vm0, %v1242_v0  ;;  %v460_v11 = vld [vmem:[#allocation5 + $0x70] sm:$0xff] }
  0x93   :  { %952 = vmatprep.subr.bf16.mxu0 %v1243_v1  ;;  %948 = vmatpush3.bf16.msra.mxu1 %v947_v33  ;;  %v995_v13 = vpack.c.bf16 %v461_v12, %v460_v11 }
  0x94   :  { %973 = vmatprep.subr.bf16.mxu1 %v1243_v1 }
  0x96   :  { %954 = vmatpush3.bf16.msra.mxu0 %v953_v15 }
  0x97   :  { %955 = vmatprep.subr.bf16.mxu0 %v1243_v1 }
  0x9a   :  { %957 = vmatpush3.bf16.msra.mxu0 %v956_v18 }
  0x9b   :  { %958 = vmatprep.subr.bf16.mxu0 %v1243_v1 }
  0x9e   :  { %960 = vmatpush3.bf16.msra.mxu0 %v959_v21 }
  0x9f   :  { %961 = vmatprep.subr.bf16.mxu0 %v1243_v1 }
  0xa2   :  { %963 = vmatpush3.bf16.msra.mxu0 %v962_v24 }
  0xa3   :  { %964 = vmatprep.subr.bf16.mxu0 %v1243_v1 }
  0xa6   :  { %966 = vmatpush3.bf16.msra.mxu0 %v965_v27 }
  0xa7   :  { %967 = vmatprep.subr.bf16.mxu0 %v1243_v1 }
  0xaa   :  { %969 = vmatpush3.bf16.msra.mxu0 %v968_v30  ;;  %v123_v30 = vld [vmem:[#allocation2 + $0x8] sm:$0xff] }
  0xab   :  { %970 = vmatprep.subr.bf16.mxu0 %v1243_v1 }
  0xae   :  { %972 = vmatpush3.bf16.msra.mxu0 %v971_v36  ;;  %v998_v36 = vpack.c.bf16 %v542_v35, %v541_v34 }
  0xaf   :  { %997 = vmatprep.subr.bf16.mxu0 %v1243_v1 }
 0x164   :  { %v238_v44 = vpop.f32.mrb[0].mxu0 }
 0x165   :  { %v239_v45 = vadd.f32 %v238_v44, %v165_v42  ;;  %v240_v46 = vpop.f32.mrb[1].mxu0  ;;  %v1004_v42 = vpack.c.bf16 %v546_v41, %v545_v40  ;;  %v548_v44 = vld [vmem:[#allocation7 + $0x38] sm:$0xff] }
 0x166   :  { %v241_v47 = vadd.f32 %v240_v46, %v169_v43  ;;  %v547_v43 = vld [vmem:[#allocation7 + $0x30] sm:$0xff]  ;;  %v549_v46 = vld [vmem:[#allocation7 + $0x40] sm:$0xff] }
 0x167   :  { %v245_v48 = vmul.f32 0.2, %v239_v45  ;;  %vm243_vm1 = vcmp.ge.f32.partialorder %v239_v45, 0.0 }
 0x168   :  { %vm244_vm2 = vcmp.ge.f32.partialorder %v241_v47, 0.0  ;;  %v246_v49 = vmul.f32 0.2, %v241_v47 }
 0x169   :  { %v247_v50 = vsel %vm243_vm1, %v239_v45, %v245_v48  ;;  %v1007_v45 = vpack.c.bf16 %v548_v44, %v547_v43 }
 0x16a   :  { %786 = vmatmul.mubr.f32.vlgmr.msra.gmra.mrb[0].mxu1 %v247_v50  ;;  %v248_v51 = vsel %vm244_vm2, %v241_v47, %v246_v49  ;;  %v550_v47 = vld [vmem:[#allocation7 + $0x48] sm:$0xff]  ;;  %v551_v49 = vld [vmem:[#allocation7 + $0x50] sm:$0xff]  ;;  %v552_v50 = vld [vmem:[#allocation7 + $0x58] sm:$0xff] }
 0x16b   :  { %821 = vmatmul.mubr.f32.vlgmr.msra.gmra.mrb[2].mxu0 %v248_v51  ;;  %855 = vmatprep.mubr.msk.f32.mxu1 %vm1244_vm0, %v1242_v0  ;;  %v1010_v48 = vpack.c.bf16 %v550_v47, %v549_v46  ;;  %v1013_v51 = vpack.c.bf16 %v552_v50, %v551_v49 }
 0x16c   :  { %890 = vmatprep.mubr.msk.f32.mxu0 %vm1244_vm0, %v1242_v0  ;;  %975 = vmatpush3.bf16.msra.mxu1 %v974_v55  ;;  %v454_v0 = vld [vmem:[#allocation5 + $0x40] sm:$0xff]  ;;  %v555_v55 = vld [vmem:[#allocation7 + $0x70] sm:$0xff] }
 0x16d   :  { %976 = vmatprep.subr.bf16.mxu1 %v1243_v1  ;;  %v986_v3 = vpack.c.bf16 %v455_v2, %v454_v0  ;;  %999 = vmatpush3.bf16.msra.mxu0 %v998_v36 }
 0x16e   :  { %1000 = vmatprep.subr.bf16.mxu0 %v1243_v1 }
 0x170   :  { %978 = vmatpush3.bf16.msra.mxu1 %v977_v57  ;;  %v1019_v57 = vpack.c.bf16 %v556_v56, %v555_v55 }
 0x171   :  { %979 = vmatprep.subr.bf16.mxu1 %v1243_v1  ;;  %1002 = vmatpush3.bf16.msra.mxu0 %v1001_v39 }
 0x172   :  { %1003 = vmatprep.subr.bf16.mxu0 %v1243_v1 }
 0x174   :  { %981 = vmatpush3.bf16.msra.mxu1 %v980_v60 }
 0x175   :  { %982 = vmatprep.subr.bf16.mxu1 %v1243_v1  ;;  %1005 = vmatpush3.bf16.msra.mxu0 %v1004_v42 }
 0x176   :  { %1006 = vmatprep.subr.bf16.mxu0 %v1243_v1 }
 0x178   :  { %984 = vmatpush3.bf16.msra.mxu1 %v983_v63 }
 0x179   :  { %985 = vmatprep.subr.bf16.mxu1 %v1243_v1  ;;  %1008 = vmatpush3.bf16.msra.mxu0 %v1007_v45 }
 0x17a   :  { %1009 = vmatprep.subr.bf16.mxu0 %v1243_v1 }
 0x17c   :  { %987 = vmatpush3.bf16.msra.mxu1 %v986_v3  ;;  %v683_v3 = vld [vmem:[%s1496_s2] ss:$0 sm:$0xff] }
 0x17d   :  { %988 = vmatprep.subr.bf16.mxu1 %v1243_v1  ;;  %1011 = vmatpush3.bf16.msra.mxu0 %v1010_v48 }
 0x17e   :  { %1012 = vmatprep.subr.bf16.mxu0 %v1243_v1 }
 0x180   :  { %990 = vmatpush3.bf16.msra.mxu1 %v989_v6 }
 0x181   :  { %991 = vmatprep.subr.bf16.mxu1 %v1243_v1  ;;  %1014 = vmatpush3.bf16.msra.mxu0 %v1013_v51 }
 0x182   :  { %1015 = vmatprep.subr.bf16.mxu0 %v1243_v1 }
 0x184   :  { %993 = vmatpush3.bf16.msra.mxu1 %v992_v9 }
 0x185   :  { %994 = vmatprep.subr.bf16.mxu1 %v1243_v1  ;;  %1017 = vmatpush3.bf16.msra.mxu0 %v1016_v54 }
 0x186   :  { %1018 = vmatprep.subr.bf16.mxu0 %v1243_v1 }
 0x188   :  { %996 = vmatpush3.bf16.msra.mxu1 %v995_v13 }
 0x189   :  { %1020 = vmatpush3.bf16.msra.mxu0 %v1019_v57 }
 0x23d   :  { %v337_v15 = vpop.f32.mrb[0].mxu1 }
 0x23e   :  { %v338_v16 = vadd.f32 %v679_v14, %v337_v15  ;;  %v787_v17 = vpop.f32.mrb[1].mxu1  ;;  %v429_v18 = vpop.f32.mrb[2].mxu0 }
 0x23f   :  { %v822_v19 = vpop.f32.mrb[3].mxu0  ;;  %v430_v29 = vadd.f32 %v680_v28, %v429_v18 }
 0x240   :  { %v681_v20 = vmul.f32 -1.442695, %v338_v16 }
 0x241   :  { %v441_v31 = vsub.f32 %v123_v30, %v430_v29 }
 0x242   :  { %1038 = vpow2.f32 %v681_v20 }
 0x24c   :  { %v1039_v21 = vpop.eup %1038 }
 0x24d   :  { %v436_v22 = vadd.f32 1.0, %v1039_v21 }
 0x24f   :  { %1040 = vrcp.f32 %v436_v22 }
 0x259   :  { %v1041_v23 = vpop.eup %1040 }
 0x25a   :  { %v439_v24 = vmul.f32 2.0, %v1041_v23 }
 0x25c   :  { %v682_v25 = vadd.f32 -1.0, %v439_v24 }
 0x25e   :  { %v442_v26 = vsub.f32 0.0, %v682_v25  ;;  %636 = vadd.xlane.f32.xlu0 %v682_v25 }
 0x260   :  { %v443_v27 = vmul.f32 1.442695, %v442_v26 }
 0x262   :  { %1042 = vpow2.f32 %v443_v27 }
 0x26c   :  { %v1043_v32 = vpop.eup %1042 }
 0x26d   :  { %v445_v33 = vmul.f32 %v1043_v32, %v441_v31 }
 0x26f   :  { %856 = vmatmul.mubr.f32.vlgmr.msra.gmra.mrb[2].mxu1 %v445_v33  ;;  %635 = vst [vmem:[#allocation13 + $0x8] sm:$0xff] %v445_v33 }
 0x2eb   :  { %v637_v58 = vpop.xlane.xlu0 %636 }
 0x2ec   :  { %v638_v59 = vrot.slane %v637_v58, 4 }
 0x2ee   :  { %v639_v60 = vadd.f32 %v638_v59, %v637_v58 }
 0x2f0   :  { %v640_v61 = vrot.slane %v639_v60, 2 }
 0x2f2   :  { %v641_v62 = vadd.f32 %v640_v61, %v639_v60 }
 0x2f4   :  { %v642_v63 = vrot.slane %v641_v62, 1 }
 0x2f6   :  { %v643_v0 = vadd.f32 %v642_v63, %v641_v62 }
 0x2f8   :  { %1021 = vpush %v643_v0 }
 0x329   :  { %s1022_s8 = spop %1021 }
 0x32a   :  { %v645_v2 = vstv %s1022_s8 }
 0x32b   :  { %646 = vst [vmem:[#allocation14] sm:$0xff] %v645_v2 }
 0x342   :  { %v534_v1 = vpop.f32.mrb[2].mxu1 }
 0x343   :  { %v535_v4 = vadd.f32 %v683_v3, %v534_v1  ;;  %v857_v5 = vpop.f32.mrb[3].mxu1 }
 0x345   :  { %vm538_vm3 = vcmp.ge.f32.partialorder %v535_v4, 0.0  ;;  %v539_v6 = vmul.f32 0.2, %v535_v4 }
 0x347   :  { %v540_v7 = vsel %vm538_vm3, %v535_v4, %v539_v6 }
 0x348   :  { %891 = vmatmul.mubr.f32.vlgmr.msra.gmra.mrb[4].mxu0 %v540_v7 }
 0x349   :  { %1187 = shalt.err (!%p1184_p10)
}
 0x34a   :  { %s1188_s2 = scalar_lea.hbm %s1506_s12, 128 }
 0x34b   :  { %p1189_p11 = scmp.ne.s32.totalorder %s1506_s12, %s1188_s2  ;;  %p1192_p12 = scmp.lt.u32.totalorder %s1188_s2, %s1506_s12 }
 0x34d   :  { %p1194_p13 = pnand %p1192_p12, %p1189_p11 }
 0x34f   :  { %1197 = shalt.err (!%p1194_p13)
}
 0x350   :  { %666 = dma.vmem_to_hbm [thread:$0]  %s664_s27, 128, %s1506_s12, [#allocation15]   ;;  %v684_v8 = vld [vmem:[%s1498_s4] ss:$0 sm:$0xff] }
 0x351   :  { %s1246_s15 = smov [#allocation13]  }
 0x352   :  { %s653_s21 = sshll.u32 %s1246_s15, 4  ;;  %s654_s21 = int_to_ptr.vmem [resolvable:$true] %s653_s21 }
 0x353   :  { %s1198_s24 = scalar_lea.vmem %s654_s21, 256  ;;  %p1203_p1 = scmp.lt.s32.totalorder %s654_s21, %s654_s21 }
 0x354   :  { %p1199_p0 = scmp.ne.s32.totalorder %s654_s21, %s1198_s24  ;;  %p1204_p2 = scmp.lt.s32.totalorder %s1198_s24, %s1198_s24 }
 0x356   :  { %p1205_p3 = por %p1204_p2, %p1203_p1 }
 0x358   :  { %p1206_p4 = pnand %p1205_p3, %p1199_p0 }
 0x41b   :  { %v629_v9 = vpop.f32.mrb[4].mxu0 }
 0x41c   :  { %v630_v11 = vadd.f32 %v684_v8, %v629_v9  ;;  %v892_v12 = vpop.f32.mrb[5].mxu0 }
 0x41e   :  { %v633_v13 = vsub.f32 %v1417_v10, %v630_v11 }
 0x420   :  { %634 = vst [vmem:[#allocation13] sm:$0xff] %v633_v13 }
 0x421   :  { %1209 = shalt.err (!%p1206_p4)
}
 0x422   :  { %s1210_s4 = scalar_lea.hbm %s1505_s11, 256 }
 0x423   :  { %p1211_p5 = scmp.ne.s32.totalorder %s1505_s11, %s1210_s4  ;;  %p1214_p6 = scmp.lt.u32.totalorder %s1210_s4, %s1505_s11 }
 0x425   :  { %p1216_p7 = pnand %p1214_p6, %p1211_p5 }
 0x427   :  { %1219 = shalt.err (!%p1216_p7)
}
 0x428   :  { %656 = dma.vmem_to_hbm [thread:$0]  %s654_s21, 256, %s1505_s11, [#allocation4]  }
 0x429   :  { %1228 = dma.done.wait [#allocation4], 256  }
 0x42a   :  { %1229 = vsyncadd [#allocation4], 4294967040 }
 0x42b   :  { %1230 = dma.done.wait [#allocation15], 128  }
 0x42c   :  { %1231 = vsyncadd [#allocation15], 4294967168 }
 0x42d   :  { %673 = vsyncpa [#allocation3], 1 }
 0x42e   :  { %674 = vsyncpa [#allocation6], 1 }
 0x42f   :  { %675 = vsyncpa [#allocation9], 1 }
 0x430   :  { %676 = vsyncpa [#allocation12], 1 }
 0x431   :  { %677 = vsyncpa [#allocation4], 1 }
 0x432   :  { %678 = vsyncpa [#allocation15], 1 }

</bundles_post_ra>
